<compile_context>
chip_gen: v5e
topology: v5e:2x2
jax: 0.10.0
libtpu: 0.0.40
codegen_flags: <defaults>
</compile_context>

<pallas_src>
import functools

import jax
import jax.numpy as jnp
from jax import lax
from jax.experimental import pallas as pl
from jax.experimental.pallas import tpu as pltpu

MARGIN = 0.3
NORM_EPS = 1e-12                       # F.normalize default eps
PAD_LABEL = int(jnp.iinfo(jnp.int32).min)  # sentinel outside any real label domain


def _round_up(x: int, m: int) -> int:
    return ((x + m - 1) // m) * m


def _bh_triplet_kernel(emb_i_ref, emb_j_ref, lab_i_ref, lab_j_ref, loss_ref,
                       min_pos_sc, max_neg_sc, *, margin: float):
    """Grid = (anchor tiles [parallel], gallery tiles [arbitrary/reduction])."""
    j = pl.program_id(1)

    # ---- init running accumulators on the first gallery tile ---------------
    @pl.when(j == 0)
    def _():
        min_pos_sc[...] = jnp.full_like(min_pos_sc, jnp.inf)     # min same-label dot
        max_neg_sc[...] = jnp.full_like(max_neg_sc, -jnp.inf)    # max diff-label dot

    # ---- cosine similarities for this (i, j) tile pair (MXU, bf16 in / f32 acc)
    # A . B^T expressed by contracting dim 1 of both operands (no transpose).
    dot = lax.dot_general(emb_i_ref[...], emb_j_ref[...],
                          dimension_numbers=(((1,), (1,)), ((), ())),
                          preferred_element_type=jnp.float32)     # (TI, TJ)

    # ---- label masks (padded gallery columns carry the PAD_LABEL sentinel) --
    li = lab_i_ref[...]                    # (TI, 1) int32
    lj = lab_j_ref[...]                    # (1, TJ) int32
    same = li == lj                        # (TI, TJ)
    neg = jnp.logical_and(li != lj, lj != PAD_LABEL)

    # hardest positive distance = 1 - min(dot over same-label columns)
    min_pos_sc[...] = jnp.minimum(
        min_pos_sc[...],
        jnp.min(jnp.where(same, dot, jnp.inf), axis=-1, keepdims=True))
    # hardest negative distance = 1 - max(dot over diff-label columns)
    max_neg_sc[...] = jnp.maximum(
        max_neg_sc[...],
        jnp.max(jnp.where(neg, dot, -jnp.inf), axis=-1, keepdims=True))

    # ---- finalize: hinge per anchor row -------------------------------------
    # hp - hn = (1 - min_pos_dot) - (1 - max_neg_dot) = max_neg_dot - min_pos_dot
    @pl.when(j == pl.num_programs(1) - 1)
    def _():
        loss_ref[...] = jnp.maximum(
            max_neg_sc[...] - min_pos_sc[...] + margin, 0.0)


def batch_hard_triplet_loss(embeddings, labels, margin: float = MARGIN):
    """embeddings: [B, D] float array, labels: [B] int array. Returns scalar."""
    B, D = embeddings.shape

    # --- normalize once (f32 math), feed the MXU bf16 ------------------------
    emb_f32 = embeddings.astype(jnp.float32)
    norm = jnp.sqrt(jnp.sum(emb_f32 * emb_f32, axis=1, keepdims=True))
    emb_n = (emb_f32 / jnp.maximum(norm, NORM_EPS)).astype(jnp.bfloat16)

    # --- tile selection -------------------------------------------------------
    # Anchor tile TI: <= 256 rows, split >= 2 ways whenever possible so both
    # v7x TensorCores get work (anchor axis is "parallel").
    TI = min(256, max(8, _round_up(-(-B // 2), 8)))
    B_pad_i = _round_up(B, TI)
    num_i = B_pad_i // TI
    # Gallery tile TJ: 128 wide (keeps every (TI,TJ) f32 intermediate <= 32
    # vregs and maps to the v5e 128-wide MXU), or the whole 8-aligned batch.
    TJ = 128 if B > 128 else _round_up(B, 8)
    B_pad_j = _round_up(B, TJ)
    num_j = B_pad_j // TJ

    B_pad_emb = max(B_pad_i, B_pad_j)
    emb_pad = jnp.pad(emb_n, ((0, B_pad_emb - B), (0, 0)))

    lab = labels.astype(jnp.int32)
    lab_row = jnp.pad(lab, (0, B_pad_i - B),
                      constant_values=PAD_LABEL).reshape(B_pad_i, 1)
    lab_col = jnp.pad(lab, (0, B_pad_j - B),
                      constant_values=PAD_LABEL).reshape(1, B_pad_j)

    kernel = functools.partial(_bh_triplet_kernel, margin=float(margin))

    cost = pl.CostEstimate(
        flops=2 * B_pad_i * B_pad_j * D,
        transcendentals=0,
        bytes_accessed=(num_i * num_j * TJ * D + num_i * TI * D) * 2   # bf16 emb
        + (num_i * TI + num_i * num_j * TJ) * 4                        # labels
        + B_pad_i * 4,                                                 # output
    )

    losses = pl.pallas_call(
        kernel,
        out_shape=jax.ShapeDtypeStruct((B_pad_i, 1), jnp.float32),
        grid_spec=pltpu.PrefetchScalarGridSpec(
            num_scalar_prefetch=0,
            grid=(num_i, num_j),
            in_specs=[
                pl.BlockSpec((TI, D), lambda i, j: (i, 0)),   # anchor rows (resident over j)
                pl.BlockSpec((TJ, D), lambda i, j: (j, 0)),   # gallery rows (streamed)
                pl.BlockSpec((TI, 1), lambda i, j: (i, 0)),   # anchor labels
                pl.BlockSpec((1, TJ), lambda i, j: (0, j)),   # gallery labels
            ],
            out_specs=pl.BlockSpec((TI, 1), lambda i, j: (i, 0)),
            scratch_shapes=[
                pltpu.VMEM((TI, 1), jnp.float32),   # running min same-label dot
                pltpu.VMEM((TI, 1), jnp.float32),   # running max diff-label dot
            ],
        ),
        compiler_params=pltpu.CompilerParams(
            dimension_semantics=("parallel", "arbitrary")),
        cost_estimate=cost,
    )(emb_pad, emb_pad, lab_row, lab_col)

    # Tiny scalar epilogue: drop padded anchor rows, take the mean.
    return jnp.sum(losses[:B, 0]) / jnp.float32(B)


if __name__ == "__main__":
    key = jax.random.PRNGKey(0)
    k1, k2 = jax.random.split(key)
    B, D = 16, 64  # [batch_size, embed_dim]
    embeddings = jax.random.normal(k1, (B, D), dtype=jnp.float32)
    labels = jax.random.randint(k2, (B,), 0, 4)

    out = batch_hard_triplet_loss(embeddings, labels)
    jax.block_until_ready(out)

    # Pure-JAX reference (intended semantics of the PyTorch module, f32).
    en = embeddings / jnp.maximum(
        jnp.sqrt(jnp.sum(embeddings * embeddings, axis=1, keepdims=True)),
        NORM_EPS)
    d = 1.0 - en @ en.T
    same = labels[:, None] == labels[None, :]
    hp = jnp.max(jnp.where(same, d, 0.0), axis=1)
    hn = jnp.min(jnp.where(same, jnp.inf, d), axis=1)
    ref = jnp.mean(jnp.maximum(hp - hn + MARGIN, 0.0))

    # bf16 matmul operands -> loosened tolerance vs. the pure-f32 reference.
    assert jnp.allclose(out, ref, atol=2e-2, rtol=2e-2), (out, ref)
    print("KERNEL_OK")
</pallas_src>

<mosaic_0001>
module attributes {stable_mosaic.version = 11 : i64} {
  func.func @_bh_triplet_kernel(%arg0: i32, %arg1: i32, %arg2: memref<8x64xbf16, #tpu.memory_space<vmem>>, %arg3: memref<16x64xbf16, #tpu.memory_space<vmem>>, %arg4: memref<8x1xi32, #tpu.memory_space<vmem>>, %arg5: memref<1x16xi32, #tpu.memory_space<vmem>>, %arg6: memref<8x1xf32, #tpu.memory_space<vmem>>, %arg7: memref<8x1xf32, #tpu.memory_space<vmem>>, %arg8: memref<8x1xf32, #tpu.memory_space<vmem>>) attributes {dimension_semantics = [#tpu.dimension_semantics<parallel>, #tpu.dimension_semantics<arbitrary>], iteration_bounds = array<i64: 2, 1>, scalar_prefetch = 0 : i64, scratch_operands = 2 : i64, tpu.core_type = #tpu.core_type<tc>, window_params = [{transform_indices = @transform_0, window_bounds = array<i64: 8, 64>}, {transform_indices = @transform_1, window_bounds = array<i64: 16, 64>}, {transform_indices = @transform_2, window_bounds = array<i64: 8, 1>}, {transform_indices = @transform_3, window_bounds = array<i64: 1, 16>}, {transform_indices = @transform_4, window_bounds = array<i64: 8, 1>}]} {
    %c0_i32 = arith.constant 0 : i32
    %0 = arith.cmpi eq, %arg1, %c0_i32 : i32
    %1 = arith.extui %0 : i1 to i32
    %c0_i32_0 = arith.constant 0 : i32
    %2 = arith.cmpi ne, %1, %c0_i32_0 : i32
    scf.if %2 {
      %cst_22 = arith.constant 0x7F800000 : f32
      %35 = vector.broadcast %cst_22 : f32 to vector<8x1xf32>
      %c0_23 = arith.constant 0 : index
      %c0_24 = arith.constant 0 : index
      %36 = vector.load %arg7[%c0_23, %c0_24] : memref<8x1xf32, #tpu.memory_space<vmem>>, vector<8x1xf32>
      tpu.vector_store %arg7[%c0_23, %c0_24], %35 {strides = array<i32>} : memref<8x1xf32, #tpu.memory_space<vmem>>, vector<8x1xf32>,
      %cst_25 = arith.constant 0xFF800000 : f32
      %37 = vector.broadcast %cst_25 : f32 to vector<8x1xf32>
      %c0_26 = arith.constant 0 : index
      %c0_27 = arith.constant 0 : index
      %38 = vector.load %arg8[%c0_26, %c0_27] : memref<8x1xf32, #tpu.memory_space<vmem>>, vector<8x1xf32>
      tpu.vector_store %arg8[%c0_26, %c0_27], %37 {strides = array<i32>} : memref<8x1xf32, #tpu.memory_space<vmem>>, vector<8x1xf32>,
    } else {
    }
    %c0 = arith.constant 0 : index
    %c0_1 = arith.constant 0 : index
    %3 = vector.load %arg2[%c0, %c0_1] : memref<8x64xbf16, #tpu.memory_space<vmem>>, vector<8x64xbf16>
    %c0_2 = arith.constant 0 : index
    %c0_3 = arith.constant 0 : index
    %4 = vector.load %arg3[%c0_2, %c0_3] : memref<16x64xbf16, #tpu.memory_space<vmem>>, vector<16x64xbf16>
    %cst = arith.constant dense<0.000000e+00> : vector<8x16xf32>
    %5 = tpu.matmul %3, %4, %cst {dimension_numbers = #tpu.dot_dimension_numbers<[1], [1], [0], [0], [0, 0, 1, 0], [], []>} : vector<8x64xbf16>, vector<16x64xbf16>, vector<8x16xf32> -> vector<8x16xf32>
    %c0_4 = arith.constant 0 : index
    %c0_5 = arith.constant 0 : index
    %6 = vector.load %arg4[%c0_4, %c0_5] : memref<8x1xi32, #tpu.memory_space<vmem>>, vector<8x1xi32>
    %c0_6 = arith.constant 0 : index
    %c0_7 = arith.constant 0 : index
    %7 = vector.load %arg5[%c0_6, %c0_7] : memref<1x16xi32, #tpu.memory_space<vmem>>, vector<1x16xi32>
    %8 = vector.broadcast %6 : vector<8x1xi32> to vector<8x16xi32>
    %9 = vector.broadcast %7 : vector<1x16xi32> to vector<8x16xi32>
    %10 = arith.cmpi eq, %8, %9 : vector<8x16xi32>
    %11 = vector.broadcast %6 : vector<8x1xi32> to vector<8x16xi32>
    %12 = vector.broadcast %7 : vector<1x16xi32> to vector<8x16xi32>
    %13 = arith.cmpi ne, %11, %12 : vector<8x16xi32>
    %c-2147483648_i32 = arith.constant -2147483648 : i32
    %14 = vector.broadcast %c-2147483648_i32 : i32 to vector<1x16xi32>
    %15 = arith.cmpi ne, %7, %14 : vector<1x16xi32>
    %16 = vector.broadcast %15 : vector<1x16xi1> to vector<8x16xi1>
    %17 = arith.andi %13, %16 : vector<8x16xi1>
    %c0_8 = arith.constant 0 : index
    %c0_9 = arith.constant 0 : index
    %18 = vector.load %arg7[%c0_8, %c0_9] : memref<8x1xf32, #tpu.memory_space<vmem>>, vector<8x1xf32>
    %cst_10 = arith.constant 0x7F800000 : f32
    %19 = vector.broadcast %cst_10 : f32 to vector<8x16xf32>
    %20 = arith.select %10, %5, %19 : vector<8x16xi1>, vector<8x16xf32>
    %cst_11 = arith.constant dense<0x7F800000> : vector<8xf32>
    %21 = vector.multi_reduction <minimumf>, %20, %cst_11 [1] : vector<8x16xf32> to vector<8xf32>
    %22 = vector.shape_cast %21 : vector<8xf32> to vector<8x1xf32>
    %23 = arith.minimumf %18, %22 : vector<8x1xf32>
    %c0_12 = arith.constant 0 : index
    %c0_13 = arith.constant 0 : index
    %24 = vector.load %arg7[%c0_12, %c0_13] : memref<8x1xf32, #tpu.memory_space<vmem>>, vector<8x1xf32>
    tpu.vector_store %arg7[%c0_12, %c0_13], %23 {strides = array<i32>} : memref<8x1xf32, #tpu.memory_space<vmem>>, vector<8x1xf32>,
    %c0_14 = arith.constant 0 : index
    %c0_15 = arith.constant 0 : index
    %25 = vector.load %arg8[%c0_14, %c0_15] : memref<8x1xf32, #tpu.memory_space<vmem>>, vector<8x1xf32>
    %cst_16 = arith.constant 0xFF800000 : f32
    %26 = vector.broadcast %cst_16 : f32 to vector<8x16xf32>
    %27 = arith.select %17, %5, %26 : vector<8x16xi1>, vector<8x16xf32>
    %cst_17 = arith.constant dense<0xFF800000> : vector<8xf32>
    %28 = vector.multi_reduction <maximumf>, %27, %cst_17 [1] : vector<8x16xf32> to vector<8xf32>
    %29 = vector.shape_cast %28 : vector<8xf32> to vector<8x1xf32>
    %30 = arith.maximumf %25, %29 : vector<8x1xf32>
    %c0_18 = arith.constant 0 : index
    %c0_19 = arith.constant 0 : index
    %31 = vector.load %arg8[%c0_18, %c0_19] : memref<8x1xf32, #tpu.memory_space<vmem>>, vector<8x1xf32>
    tpu.vector_store %arg8[%c0_18, %c0_19], %30 {strides = array<i32>} : memref<8x1xf32, #tpu.memory_space<vmem>>, vector<8x1xf32>,
    %c0_i32_20 = arith.constant 0 : i32
    %32 = arith.cmpi eq, %arg1, %c0_i32_20 : i32
    %33 = arith.extui %32 : i1 to i32
    %c0_i32_21 = arith.constant 0 : i32
    %34 = arith.cmpi ne, %33, %c0_i32_21 : i32
    scf.if %34 {
      %c0_22 = arith.constant 0 : index
      %c0_23 = arith.constant 0 : index
      %35 = vector.load %arg8[%c0_22, %c0_23] : memref<8x1xf32, #tpu.memory_space<vmem>>, vector<8x1xf32>
      %c0_24 = arith.constant 0 : index
      %c0_25 = arith.constant 0 : index
      %36 = vector.load %arg7[%c0_24, %c0_25] : memref<8x1xf32, #tpu.memory_space<vmem>>, vector<8x1xf32>
      %37 = arith.subf %35, %36 : vector<8x1xf32>
      %cst_26 = arith.constant 3.000000e-01 : f32
      %38 = vector.broadcast %cst_26 : f32 to vector<8x1xf32>
      %39 = arith.addf %37, %38 : vector<8x1xf32>
      %cst_27 = arith.constant 0.000000e+00 : f32
      %40 = vector.broadcast %cst_27 : f32 to vector<8x1xf32>
      %41 = arith.maximumf %39, %40 : vector<8x1xf32>
      %c0_28 = arith.constant 0 : index
      %c0_29 = arith.constant 0 : index
      %42 = vector.load %arg6[%c0_28, %c0_29] : memref<8x1xf32, #tpu.memory_space<vmem>>, vector<8x1xf32>
      tpu.vector_store %arg6[%c0_28, %c0_29], %41 {strides = array<i32>} : memref<8x1xf32, #tpu.memory_space<vmem>>, vector<8x1xf32>,
    } else {
    }
    return
  }
  func.func @transform_0(%arg0: i32, %arg1: i32) -> (i32, i32) {
    %c0_i32 = arith.constant 0 : i32
    %c0_i32_0 = arith.constant 0 : i32
    return %arg0, %c0_i32 : i32, i32
  }
  func.func @transform_1(%arg0: i32, %arg1: i32) -> (i32, i32) {
    %c0_i32 = arith.constant 0 : i32
    %c0_i32_0 = arith.constant 0 : i32
    return %arg1, %c0_i32 : i32, i32
  }
  func.func @transform_2(%arg0: i32, %arg1: i32) -> (i32, i32) {
    %c0_i32 = arith.constant 0 : i32
    %c0_i32_0 = arith.constant 0 : i32
    return %arg0, %c0_i32 : i32, i32
  }
  func.func @transform_3(%arg0: i32, %arg1: i32) -> (i32, i32) {
    %c0_i32 = arith.constant 0 : i32
    %c0_i32_0 = arith.constant 0 : i32
    return %c0_i32, %arg1 : i32, i32
  }
  func.func @transform_4(%arg0: i32, %arg1: i32) -> (i32, i32) {
    %c0_i32 = arith.constant 0 : i32
    %c0_i32_0 = arith.constant 0 : i32
    return %arg0, %c0_i32 : i32, i32
  }
}

</mosaic_0001>

<bundles_post_ra>
// kernel: tpu_custom_call.1
= control target key start
LH: loop header
LB: loop body
LE: loop exit
PB: predicated region body
PF: predicated region fallthrough
CT: control target
= control target key end

     0   :  { %s532_s15 = smov 0   ;;  %s534_s16 = smov 0   ;;  %s590_s0 = inlined_call_operand.vmem [shape: bf16[16,64], index: 0, kind: input, shape index: {}]   ;;  %s591_s1 = inlined_call_operand.vmem [shape: bf16[16,64], index: 1, kind: input, shape index: {}]   ;;  %s592_s2 = inlined_call_operand.vmem [shape: s32[16,1], index: 2, kind: input, shape index: {}]   ;;  %s593_s3 = inlined_call_operand.vmem [shape: s32[1,16], index: 3, kind: input, shape index: {}]   ;;  %s594_s4 = inlined_call_operand.vmem [shape: f32[16,1], index: 4, kind: output, shape index: {}]  }
   0x1   :  { %s536_s17 = smov 0  }
   0x2 LB: > { %s26_s18 = sadd.s32 1, %s498_s16  ;;  %p439_p0 = scmp.ge.s32.totalorder %s502_s17, 1  ;;  %s502_s17 = sphi %s536_s17, %s14_s17   ;;  %s498_s16 = sphi %s534_s16, %s596_s16   ;;  %s494_s15 = sphi %s532_s15, %s595_s15  }
   0x3   : > { %p28_p1 = scmp.ge.s32.totalorder %s26_s18, 2  ;;  %p201_p2 = scmp.lt.s32.totalorder %s502_s17, 3 }
   0x5   : > { %s598_s18 = smov (%p28_p1, %s26_s18), 0  ;;  %p202_p3 = pnand %p439_p0, %p201_p2 }
   0x6   : > { %p237_p4 = scmp.lt.s32.totalorder (!%p202_p3), %s494_s15, 1 }
   0x7   : > { %205 = sbr.rel (%p202_p3) target bundleno = 283 (0x11b), region = 36 }
   0xc   : > { %v450_v0 = vld [vmem:[%s591_s1] sm:$0xff]  ;;  %vm274_vm0 = vcmask 523264   ;;  %v504_v1 = vmov 0   ;;  %s600_s15 = smov (!%p237_p4, %s494_s15), 1  ;;  %vm263_vm1 = vcmask 7168   ;;  %v505_v5 = vmov -inf  }
   0xd   : > { %478 = vset.pattern.permute.xlu0 %v504_v1  ;;  %v279_v2 = vsel %vm274_vm0, %v450_v0, 0  ;;  %s440_s21 = sshll.u32 %s600_s15, 2  ;;  %s441_s22 = sshll.u32 %s600_s15, 3  ;;  %265 = vst.msk [vmem:[#allocation3] sm:$0xff] %vm263_vm1, %v505_v5  ;;  %v295_v6 = vld [vmem:[%s593_s3] sm:$0x1] }
   0xe   : > { %288 = vmatpush.bf16.xpose.msra.mxu0 %v279_v2  ;;  %s240_s25 = scalar_lea.vmem %s590_s0, %s440_s21  ;;  %s250_s28 = scalar_lea.vmem %s592_s2, %s441_s22  ;;  %vm302_vm2 = vcmp.ne.s32.totalorder %v295_v6, 2147483648  ;;  %v479_v9 = vld [vmem:[%s593_s3] ss:$0 sm:$0xff]  ;;  %vm309_vm7 = vcmask 130048   ;;  %v506_v17 = vmov inf  }
   0xf   : > { %v294_v3 = vld [vmem:[%s250_s28] sm:$0xff]  ;;  %v303_v7 = vsel %vm302_vm2, 1, %v504_v1  ;;  %264 = vst.msk [vmem:[#allocation2] sm:$0xff] %vm263_vm1, %v506_v17  ;;  %s257_s9 = scalar_lea.vmem %s594_s4, %s441_s22 }
  0x10   : > { %v266_v4 = vld [vmem:[%s240_s25] sm:$0xf]  ;;  %297 = vperm.xlu0 %478, %v294_v3   ;;  %v304_v8 = vperm.slane %v303_v7, 0 }
  0x12   : > { %vm305_vm3 = vcmp.eq.s32.totalorder %v304_v8, 1 }
  0x14   : > { %v316_v18 = vld [vmem:[#allocation3] sm:$0xff] }
  0x15   : > { %447 = vmatmul.msk.bf16.vlgmr.msra.gmra.mxu0 %vm274_vm0, %v266_v4 }
  0x16   : > { %v307_v19 = vld [vmem:[#allocation2] sm:$0xff] }
  0x82   : > { %v298_v10 = vpop.permute.xlu0 %297 }
  0x83   : > { %vm301_vm4 = vcmp.ne.s32.totalorder %v298_v10, %v479_v9  ;;  %vm300_vm5 = vcmp.eq.s32.totalorder %v298_v10, %v479_v9 }
  0x84   : > { %vm306_vm6 = vmand %vm301_vm4, %vm305_vm3 }
  0x92   : > { %v290_v11 = vpop.f32.mrf.mxu0 }
  0x93   : > { %v317_v12 = vsel %vm306_vm6, %v290_v11, -inf  ;;  %v308_v13 = vsel %vm300_vm5, %v290_v11, inf }
  0x94   : > { %v318_v14 = vsel %vm309_vm7, %v317_v12, -inf  ;;  %v310_v15 = vsel %vm309_vm7, %v308_v13, inf }
  0x95   : > { %319 = vmax.xlane.f32.xlu1 %v318_v14  ;;  %311 = vmin.xlane.f32.xlu0 %v310_v15 }
  0x9a   : > { %v292_v16 = vpop.f32.mrf.mxu0 }
 0x108   : > { %v320_v20 = vpop.xlane.xlu1 %319  ;;  %v312_v21 = vpop.xlane.xlu0 %311 }
 0x109   : > { %v321_v22 = vmax.f32 %v316_v18, %v320_v20  ;;  %v313_v23 = vmin.f32 %v307_v19, %v312_v21 }
 0x10b   : > { %322 = vst.msk [vmem:[#allocation3] sm:$0xff] %vm263_vm1, %v321_v22 }
 0x10c   : > { %315 = vst.msk [vmem:[#allocation2] sm:$0xff] %vm263_vm1, %v313_v23 }
 0x112   : > { %v326_v24 = vld [vmem:[#allocation3] sm:$0xff] }
 0x113   : > { %v327_v25 = vld [vmem:[#allocation2] sm:$0xff] }
 0x114   : > { %v328_v26 = vsub.f32 %v326_v24, %v327_v25 }
 0x116   : > { %v329_v27 = vadd.f32 0.3, %v328_v26 }
 0x118   : > { %v330_v28 = vmax.f32 %v329_v27, 0.0 }
 0x11a   : > { %331 = vst.msk [vmem:[%s257_s9] sm:$0xff] %vm263_vm1, %v330_v28 }
 0x11b PF: > { %s14_s17 = sadd.s32 1, %s502_s17   ;;  %s595_s15 = smov %s498_s16 }
 0x11c   : > { %p11_p5 = scmp.ge.s32.totalorder %s14_s17, 4   ;;  %s596_s16 = smov %s598_s18 }
 0x11e   :  { %13 = sbr.rel (!%p11_p5) target bundleno = 2 (0x2), region = 83 }

</bundles_post_ra>
